<compile_context>
chip_gen: v5e
topology: v5e:2x2
jax: 0.10.0
libtpu: 0.0.40
codegen_flags: <defaults>
</compile_context>

<pallas_src>
import functools

import jax
import jax.numpy as jnp
import numpy as np
from jax.experimental import pallas as pl
from jax.experimental.pallas import tpu as pltpu


def _soft_focal_kernel(x_ref, t_ref, o_ref, *, alpha, gamma, label_smoothing, eps):
    # x_ref: (NB, C, TS) f32 logits   t_ref: (NB, TS) i32   o_ref: (NB, TS) f32
    x = x_ref[...]                                  # (NB, C, TS)
    t = t_ref[...]                                  # (NB, TS)

    # softmax over the class axis (axis=1) + eps   (matches F.softmax(..)+eps)
    m = jnp.max(x, axis=1, keepdims=True)           # (NB, 1, TS)
    e = jnp.exp(x - m)                               # (NB, C, TS)  (only C*TS transcendental besides log)
    denom = jnp.sum(e, axis=1, keepdims=True)        # (NB, 1, TS)
    # exact reciprocal on the small (NB,1,TS) slab; approx=True would inject
    # ~1e-4 rel error into log(p) and break the 1e-5 parity with the module.
    p = e * pl.reciprocal(denom, approx=False) + eps

    # one_hot(target) + label_smoothing
    class_ids = jax.lax.broadcasted_iota(jnp.int32, x.shape, 1)   # (NB, C, TS)
    one_hot = jnp.where(class_ids == t[:, None, :], 1.0, 0.0) + label_smoothing

    # focal weight (1 - p + eps)^gamma without jnp.power when gamma is integral
    base = 1.0 - p + eps
    g = float(gamma)
    if g == 2.0:
        weight = base * base
    elif g.is_integer() and 0.0 <= g <= 8.0:
        weight = jnp.ones_like(base)
        for _ in range(int(g)):
            weight = weight * base
    else:
        weight = jnp.power(base, gamma)              # fallback: exp+log on EUP

    # keep torch.log(input_soft) semantics (log of p+eps), one log per element
    focal = (-alpha) * weight * jnp.log(p)

    o_ref[...] = jnp.sum(one_hot * focal, axis=1)    # (NB, TS)


def _pick_spatial_tile(S, max_ts=2048):
    """Largest multiple of 128 that divides S, capped at max_ts (else full S)."""
    if S % 128 != 0:
        return S                                     # full extent is always legal
    ts = min(max_ts, S)
    while S % ts != 0:
        ts -= 128
    return ts


def _pick_batch_tile(N):
    """Pack batch rows for sublane-dense stores, keeping legal block shapes."""
    if N <= 8:
        return N
    return 8 if N % 8 == 0 else 1


def soft_focal_loss(logits, target, *, alpha, gamma=2.0, reduction="none",
                    label_smoothing=0.1, eps=1e-6):
    """logits: (N, C, H, W) float32, target: (N, H, W) int class indices."""
    N, C, H, W = logits.shape
    S = H * W
    x = logits.reshape(N, C, S)
    t = target.astype(jnp.int32).reshape(N, S)

    TS = _pick_spatial_tile(S)
    NB = _pick_batch_tile(N)

    kernel = functools.partial(
        _soft_focal_kernel,
        alpha=float(alpha), gamma=float(gamma),
        label_smoothing=float(label_smoothing), eps=float(eps))

    out = pl.pallas_call(
        kernel,
        out_shape=jax.ShapeDtypeStruct((N, S), jnp.float32),
        grid_spec=pltpu.PrefetchScalarGridSpec(
            num_scalar_prefetch=0,
            grid=(N // NB, S // TS),
            in_specs=[
                pl.BlockSpec((NB, C, TS), lambda n, s: (n, 0, s)),
                pl.BlockSpec((NB, TS), lambda n, s: (n, s)),
            ],
            out_specs=pl.BlockSpec((NB, TS), lambda n, s: (n, s)),
        ),
        compiler_params=pltpu.CompilerParams(
            dimension_semantics=("parallel", "parallel")),
    )(x, t)

    loss = out.reshape(N, H, W)
    if reduction == "none":
        return loss
    elif reduction == "mean":
        # TODO(synk): could accumulate in-kernel to avoid a second HBM pass.
        return jnp.mean(loss)
    elif reduction == "sum":
        return jnp.sum(loss)
    else:
        raise NotImplementedError(f"Invalid reduction mode: {reduction}")


def _reference(logits, target, *, alpha, gamma=2.0, label_smoothing=0.1, eps=1e-6):
    # pure-JAX reference mirroring the PyTorch module (reduction='none')
    input_soft = jax.nn.softmax(logits, axis=1) + eps
    C = logits.shape[1]
    one_hot = jax.nn.one_hot(target, C, axis=1, dtype=logits.dtype) + label_smoothing
    weight = jnp.power(1.0 - input_soft + eps, gamma)
    focal = -alpha * weight * jnp.log(input_soft)
    return jnp.sum(one_hot * focal, axis=1)


if __name__ == "__main__":
    key = jax.random.PRNGKey(0)
    k1, k2 = jax.random.split(key)

    N, C, H, W = 2, 4, 16, 16
    # "module params" (alpha/gamma/label_smoothing from __init__)
    ALPHA, GAMMA, LABEL_SMOOTHING = 0.25, 2.0, 0.1

    logits = jax.random.normal(k1, (N, C, H, W), dtype=jnp.float32)
    target = jax.random.randint(k2, (N, H, W), 0, C, dtype=jnp.int32)
    # NOTE: PyTorch requires int64 labels; int32 carries the same class ids here.

    loss = soft_focal_loss(logits, target, alpha=ALPHA, gamma=GAMMA,
                           reduction="none", label_smoothing=LABEL_SMOOTHING)
    loss = jax.block_until_ready(loss)

    ref = _reference(logits, target, alpha=ALPHA, gamma=GAMMA,
                     label_smoothing=LABEL_SMOOTHING)
    np.testing.assert_allclose(np.asarray(loss), np.asarray(ref),
                               rtol=1e-5, atol=1e-5)
    print("KERNEL_OK")
</pallas_src>

<mosaic_0001>
module attributes {stable_mosaic.version = 11 : i64} {
  func.func @_soft_focal_kernel(%arg0: i32, %arg1: i32, %arg2: memref<2x4x256xf32, #tpu.memory_space<vmem>>, %arg3: memref<2x256xi32, #tpu.memory_space<vmem>>, %arg4: memref<2x256xf32, #tpu.memory_space<vmem>>) attributes {dimension_semantics = [#tpu.dimension_semantics<parallel>, #tpu.dimension_semantics<parallel>], iteration_bounds = array<i64: 1, 1>, scalar_prefetch = 0 : i64, scratch_operands = 0 : i64, tpu.core_type = #tpu.core_type<tc>, window_params = [{transform_indices = @transform_0, window_bounds = array<i64: 2, 4, 256>}, {transform_indices = @transform_1, window_bounds = array<i64: 2, 256>}, {transform_indices = @transform_2, window_bounds = array<i64: 2, 256>}]} {
    %c0 = arith.constant 0 : index
    %c0_0 = arith.constant 0 : index
    %c0_1 = arith.constant 0 : index
    %0 = vector.load %arg2[%c0, %c0_0, %c0_1] : memref<2x4x256xf32, #tpu.memory_space<vmem>>, vector<2x4x256xf32>
    %c0_2 = arith.constant 0 : index
    %c0_3 = arith.constant 0 : index
    %1 = vector.load %arg3[%c0_2, %c0_3] : memref<2x256xi32, #tpu.memory_space<vmem>>, vector<2x256xi32>
    %cst = arith.constant dense<0xFF800000> : vector<2x256xf32>
    %2 = vector.multi_reduction <maximumf>, %0, %cst [1] : vector<2x4x256xf32> to vector<2x256xf32>
    %3 = vector.shape_cast %2 : vector<2x256xf32> to vector<2x1x256xf32>
    %4 = vector.broadcast %3 : vector<2x1x256xf32> to vector<2x4x256xf32>
    %5 = arith.subf %0, %4 : vector<2x4x256xf32>
    %6 = math.exp %5 : vector<2x4x256xf32>
    %cst_4 = arith.constant dense<0.000000e+00> : vector<2x256xf32>
    %7 = vector.multi_reduction <add>, %6, %cst_4 [1] : vector<2x4x256xf32> to vector<2x256xf32>
    %8 = vector.shape_cast %7 : vector<2x256xf32> to vector<2x1x256xf32>
    %9 = tpu.reciprocal %8 : vector<2x1x256xf32> -> vector<2x1x256xf32>
    %10 = vector.broadcast %9 : vector<2x1x256xf32> to vector<2x4x256xf32>
    %11 = arith.mulf %6, %10 : vector<2x4x256xf32>
    %cst_5 = arith.constant 9.99999997E-7 : f32
    %12 = vector.broadcast %cst_5 : f32 to vector<2x4x256xf32>
    %13 = arith.addf %11, %12 : vector<2x4x256xf32>
    %14 = tpu.iota {dimensions = array<i32: 1>} : vector<2x4x256xi32>
    %15 = vector.shape_cast %1 : vector<2x256xi32> to vector<2x1x256xi32>
    %16 = vector.broadcast %15 : vector<2x1x256xi32> to vector<2x4x256xi32>
    %17 = arith.cmpi eq, %14, %16 : vector<2x4x256xi32>
    %cst_6 = arith.constant 1.000000e+00 : f32
    %cst_7 = arith.constant 0.000000e+00 : f32
    %18 = vector.broadcast %cst_6 : f32 to vector<2x4x256xf32>
    %19 = vector.broadcast %cst_7 : f32 to vector<2x4x256xf32>
    %20 = arith.select %17, %18, %19 : vector<2x4x256xi1>, vector<2x4x256xf32>
    %cst_8 = arith.constant 1.000000e-01 : f32
    %21 = vector.broadcast %cst_8 : f32 to vector<2x4x256xf32>
    %22 = arith.addf %20, %21 : vector<2x4x256xf32>
    %cst_9 = arith.constant 1.000000e+00 : f32
    %23 = vector.broadcast %cst_9 : f32 to vector<2x4x256xf32>
    %24 = arith.subf %23, %13 : vector<2x4x256xf32>
    %cst_10 = arith.constant 9.99999997E-7 : f32
    %25 = vector.broadcast %cst_10 : f32 to vector<2x4x256xf32>
    %26 = arith.addf %24, %25 : vector<2x4x256xf32>
    %27 = arith.mulf %26, %26 : vector<2x4x256xf32>
    %cst_11 = arith.constant -2.500000e-01 : f32
    %28 = vector.broadcast %cst_11 : f32 to vector<2x4x256xf32>
    %29 = arith.mulf %28, %27 : vector<2x4x256xf32>
    %30 = math.log %13 : vector<2x4x256xf32>
    %31 = arith.mulf %29, %30 : vector<2x4x256xf32>
    %32 = arith.mulf %22, %31 : vector<2x4x256xf32>
    %cst_12 = arith.constant dense<0.000000e+00> : vector<2x256xf32>
    %33 = vector.multi_reduction <add>, %32, %cst_12 [1] : vector<2x4x256xf32> to vector<2x256xf32>
    %c0_13 = arith.constant 0 : index
    %c0_14 = arith.constant 0 : index
    %34 = vector.load %arg4[%c0_13, %c0_14] : memref<2x256xf32, #tpu.memory_space<vmem>>, vector<2x256xf32>
    tpu.vector_store %arg4[%c0_13, %c0_14], %33 {strides = array<i32>} : memref<2x256xf32, #tpu.memory_space<vmem>>, vector<2x256xf32>,
    return
  }
  func.func @transform_0(%arg0: i32, %arg1: i32) -> (i32, i32, i32) {
    %c0_i32 = arith.constant 0 : i32
    %c0_i32_0 = arith.constant 0 : i32
    return %arg0, %c0_i32, %arg1 : i32, i32, i32
  }
  func.func @transform_1(%arg0: i32, %arg1: i32) -> (i32, i32) {
    %c0_i32 = arith.constant 0 : i32
    return %arg0, %arg1 : i32, i32
  }
  func.func @transform_2(%arg0: i32, %arg1: i32) -> (i32, i32) {
    %c0_i32 = arith.constant 0 : i32
    return %arg0, %arg1 : i32, i32
  }
}

</mosaic_0001>

<bundles_post_ra>
// kernel: tpu_custom_call.1
= control target key start
LH: loop header
LB: loop body
LE: loop exit
PB: predicated region body
PF: predicated region fallthrough
CT: control target
= control target key end

     0   :  { %7 = vsyncpa [#allocation3], 0  ;;  %s562_s0 = inlined_call_operand.hbm [shape: f32[2,4,256], index: 0, kind: input, shape index: {}]   ;;  %s563_s1 = inlined_call_operand.hbm [shape: s32[2,256], index: 1, kind: input, shape index: {}]   ;;  %s564_s2 = inlined_call_operand.hbm [shape: f32[2,256], index: 2, kind: output, shape index: {}]  }
   0x1   :  { %8 = vsyncpa [#allocation6], 0 }
   0x2   :  { %9 = vsyncpa [#allocation4], 0  ;;  %s14_s11 = sshll.u32 %s562_s0, 4  ;;  %s446_s12 = smov [#allocation2]   ;;  %s15_s11 = int_to_ptr.hbm [resolvable:$true] %s14_s11 }
   0x3   :  { %s16_s13 = sshll.u32 %s446_s12, 4  ;;  %s28_s16 = sshll.u32 %s563_s1, 4  ;;  %s17_s13 = int_to_ptr.vmem [resolvable:$true] %s16_s13  ;;  %s29_s16 = int_to_ptr.hbm [resolvable:$true] %s28_s16 }
   0x4   :  { %s447_s17 = smov 128   ;;  %s448_s18 = smov 8  }
   0x5   :  { %22 = dma.hbm_to_vmem [thread:$0]  %s15_s11, 256, %s17_s13, [#allocation3], %s447_s17, %s447_s17, %s448_s18  }
   0x6   :  { %s449_s19 = smov [#allocation5]  }
   0x7   :  { %s30_s20 = sshll.u32 %s449_s19, 4  ;;  %s31_s20 = int_to_ptr.vmem [resolvable:$true] %s30_s20 }
   0x8   :  { %33 = dma.hbm_to_vmem [thread:$0]  %s29_s16, 64, %s31_s20, [#allocation6]  }
   0x9   :  { %440 = dma.done.wait [#allocation3], 256  }
   0xa   :  { %441 = vsyncadd [#allocation3], 4294967040 }
   0xb   :  { %442 = dma.done.wait [#allocation6], 64  }
   0xc   :  { %443 = vsyncadd [#allocation6], 4294967232  ;;  %v42_v0 = vld [vmem:[#allocation2] sm:$0xff]  ;;  %v43_v1 = vld [vmem:[#allocation2 + $0x8] sm:$0xff]  ;;  %vm58_vm0 = vcmask 1043456   ;;  %s451_s0 = smov [#allocation7]  }
   0xd   :  { %47 = vst [vmem:[#allocation1] ss:$2 sm:$0xff] %v42_v0  ;;  %s333_s1 = sshll.u32 %s451_s0, 4  ;;  %s335_s23 = sshll.u32 %s564_s2, 4  ;;  %s334_s1 = int_to_ptr.vmem [resolvable:$true] %s333_s1  ;;  %s336_s23 = int_to_ptr.hbm [resolvable:$true] %s335_s23 }
   0xe   :  { %51 = vst [vmem:[#allocation1 + $0x10] ss:$2 sm:$0xff] %v43_v1 }
  0x14   :  { %v48_v2 = vld.sshfl [vmem:[#allocation1] sm:$0xff pattern:$0x75316420]  ;;  %v49_v3 = vld.sshfl [vmem:[#allocation1 + $0x8] sm:$0xff pattern:$0x75316420] }
  0x15   :  { %v59_v4 = vsel %vm58_vm0, %v48_v2, -inf  ;;  %v66_v5 = vsel %vm58_vm0, %v49_v3, -inf  ;;  %v52_v6 = vld.sshfl [vmem:[#allocation1 + $0x10] sm:$0xff pattern:$0x75316420] }
  0x16   :  { %v60_v7 = vrot.slane %v59_v4, 4  ;;  %v67_v8 = vrot.slane %v66_v5, 4  ;;  %v53_v9 = vld.sshfl [vmem:[#allocation1 + $0x18] sm:$0xff pattern:$0x75316420]  ;;  %v73_v10 = vsel %vm58_vm0, %v52_v6, -inf }
  0x17   :  { %v74_v11 = vrot.slane %v73_v10, 4  ;;  %v80_v12 = vsel %vm58_vm0, %v53_v9, -inf }
  0x18   :  { %v61_v13 = vmax.f32 %v59_v4, %v60_v7  ;;  %v68_v14 = vmax.f32 %v66_v5, %v67_v8  ;;  %v81_v15 = vrot.slane %v80_v12, 4 }
  0x19   :  { %v75_v16 = vmax.f32 %v73_v10, %v74_v11 }
  0x1a   :  { %v62_v17 = vrot.slane %v61_v13, 2  ;;  %v69_v18 = vrot.slane %v68_v14, 2  ;;  %v82_v19 = vmax.f32 %v80_v12, %v81_v15 }
  0x1b   :  { %v76_v20 = vrot.slane %v75_v16, 2 }
  0x1c   :  { %v63_v21 = vmax.f32 %v61_v13, %v62_v17  ;;  %v70_v22 = vmax.f32 %v68_v14, %v69_v18  ;;  %v83_v23 = vrot.slane %v82_v19, 2 }
  0x1d   :  { %v77_v24 = vmax.f32 %v75_v16, %v76_v20 }
  0x1e   :  { %v64_v25 = vrot.slane %v63_v21, 1  ;;  %v71_v26 = vrot.slane %v70_v22, 1  ;;  %v84_v27 = vmax.f32 %v82_v19, %v83_v23 }
  0x1f   :  { %v78_v29 = vrot.slane %v77_v24, 1 }
  0x20   :  { %v72_v28 = vmax.f32 %v70_v22, %v71_v26  ;;  %v85_v30 = vrot.slane %v84_v27, 1  ;;  %v65_v31 = vmax.f32 %v63_v21, %v64_v25 }
  0x21   :  { %v79_v35 = vmax.f32 %v77_v24, %v78_v29 }
  0x22   :  { %v91_v32 = vrot.slane %v72_v28, 4  ;;  %v86_v33 = vmax.f32 %v84_v27, %v85_v30 }
  0x24   :  { %v93_v34 = vsel %vm58_vm0, %v65_v31, %v91_v32  ;;  %v92_v36 = vrot.slane %v86_v33, 4  ;;  %v44_v33 = vld [vmem:[#allocation5] sm:$0xf] }
  0x25   :  { %v97_v37 = vsub.f32 %v42_v0, %v93_v34 }
  0x26   :  { %v94_v38 = vsel %vm58_vm0, %v79_v35, %v92_v36 }
  0x27   :  { %v99_v39 = vmul.f32 1.442695, %v97_v37  ;;  %v98_v40 = vsub.f32 %v43_v1, %v94_v38 }
  0x29   :  { %352 = vpow2.f32 %v99_v39  ;;  %v101_v41 = vmul.f32 1.442695, %v98_v40 }
  0x2b   :  { %354 = vpow2.f32 %v101_v41 }
  0x2f   :  { %v479_v42 = vpop.eup %352 }
  0x30   :  { %105 = vst [vmem:[#allocation1] ss:$2 sm:$0xff] %v479_v42 }
  0x31   :  { %v482_v43 = vpop.eup %354 }
  0x32   :  { %109 = vst [vmem:[#allocation1 + $0x10] ss:$2 sm:$0xff] %v482_v43 }
  0x37   :  { %v106_v44 = vld.sshfl [vmem:[#allocation1] sm:$0xff pattern:$0x75316420]  ;;  %v107_v45 = vld.sshfl [vmem:[#allocation1 + $0x8] sm:$0xff pattern:$0x75316420] }
  0x38   :  { %v116_v46 = vsel %vm58_vm0, %v106_v44, 0.0  ;;  %v123_v47 = vsel %vm58_vm0, %v107_v45, 0.0 }
  0x39   :  { %v117_v48 = vrot.slane %v116_v46, 4  ;;  %v124_v49 = vrot.slane %v123_v47, 4  ;;  %v110_v50 = vld.sshfl [vmem:[#allocation1 + $0x10] sm:$0xff pattern:$0x75316420] }
  0x3a   :  { %v111_v51 = vld.sshfl [vmem:[#allocation1 + $0x18] sm:$0xff pattern:$0x75316420]  ;;  %v130_v52 = vsel %vm58_vm0, %v110_v50, 0.0 }
  0x3b   :  { %v118_v53 = vadd.f32 %v117_v48, %v116_v46  ;;  %v125_v54 = vadd.f32 %v124_v49, %v123_v47  ;;  %v131_v55 = vrot.slane %v130_v52, 4  ;;  %v137_v56 = vsel %vm58_vm0, %v111_v51, 0.0 }
  0x3c   :  { %v138_v57 = vrot.slane %v137_v56, 4  ;;  %v216_v46 = vrot.slane %v44_v33, 1 }
  0x3d   :  { %v119_v58 = vrot.slane %v118_v53, 2  ;;  %v126_v59 = vrot.slane %v125_v54, 2  ;;  %v132_v60 = vadd.f32 %v131_v55, %v130_v52 }
  0x3e   :  { %v139_v61 = vadd.f32 %v138_v57, %v137_v56 }
  0x3f   :  { %v120_v62 = vadd.f32 %v119_v58, %v118_v53  ;;  %v127_v63 = vadd.f32 %v126_v59, %v125_v54  ;;  %v133_v0 = vrot.slane %v132_v60, 2  ;;  %v217_v53 = vrot.slane %v44_v33, 2 }
  0x40   :  { %v140_v1 = vrot.slane %v139_v61, 2  ;;  %v218_v58 = vrot.slane %v44_v33, 3 }
  0x41   :  { %v121_v2 = vrot.slane %v120_v62, 1  ;;  %v128_v3 = vrot.slane %v127_v63, 1  ;;  %v134_v4 = vadd.f32 %v133_v0, %v132_v60 }
  0x42   :  { %v141_v5 = vadd.f32 %v140_v1, %v139_v61 }
  0x43   :  { %v122_v6 = vadd.f32 %v121_v2, %v120_v62  ;;  %v129_v7 = vadd.f32 %v128_v3, %v127_v63  ;;  %v135_v8 = vrot.slane %v134_v4, 1 }
  0x44   :  { %v142_v9 = vrot.slane %v141_v5, 1 }
  0x45   :  { %356 = vrcp.f32 %v122_v6  ;;  %v489_v10 = vadd.f32 %v135_v8, %v134_v4  ;;  %v153_v13 = vand.u32 2147483647, %v122_v6  ;;  %v155_v14 = vand.u32 2147483648, %v122_v6 }
  0x46   :  { %358 = vrcp.f32 %v129_v7  ;;  %v143_v11 = vadd.f32 %v142_v9, %v141_v5  ;;  %v167_v15 = vand.u32 2147483647, %v129_v7  ;;  %v169_v16 = vand.u32 2147483648, %v129_v7 }
  0x47   :  { %360 = vrcp.f32 %v489_v10  ;;  %vm149_vm1 = vweird.f32 %v122_v6  ;;  %vm163_vm2 = vweird.f32 %v129_v7  ;;  %vm494_vm3 = vcmp.eq.f32.partialorder %v153_v13, 8.507059e+37 }
  0x48   :  { %362 = vrcp.f32 %v143_v11  ;;  %v156_v23 = vor.u32 1.1754944e-38, %v155_v14  ;;  %vm498_vm4 = vcmp.eq.f32.partialorder %v167_v15, 8.507059e+37  ;;  %v170_v26 = vor.u32 1.1754944e-38, %v169_v16 }
  0x49   :  { %v181_v30 = vand.u32 2147483647, %v489_v10  ;;  %vm177_vm7 = vweird.f32 %v489_v10  ;;  %v183_v36 = vand.u32 2147483648, %v489_v10  ;;  %v195_v37 = vand.u32 2147483647, %v143_v11 }
  0x4a   :  { %vm191_vm9 = vweird.f32 %v143_v11  ;;  %v197_v41 = vand.u32 2147483648, %v143_v11 }
  0x4b   :  { %v357_v12 = vpop.eup %356  ;;  %vm515_vm12 = vcmp.eq.f32.partialorder %v181_v30, 8.507059e+37  ;;  %vm524_vm14 = vcmp.eq.f32.partialorder %v195_v37, 8.507059e+37  ;;  %v184_v0 = vor.u32 1.1754944e-38, %v183_v36 }
  0x4c   :  { %v359_v17 = vpop.eup %358  ;;  %v145_v18 = vmul.f32 %v357_v12, %v122_v6  ;;  %vm150_vm5 = vweird.f32 %v357_v12  ;;  %v198_v57 = vor.u32 1.1754944e-38, %v197_v41 }
  0x4d   :  { %v159_v19 = vmul.f32 %v359_v17, %v129_v7  ;;  %v492_v21 = vpop.eup %360  ;;  %vm164_vm6 = vweird.f32 %v359_v17  ;;  %vm508_vm8 = vmor %vm149_vm1, %vm150_vm5  ;;  %vm225_vm5 = vcmask 1041409  }
  0x4e   :  { %v146_v20 = vsub.f32 1.0, %v145_v18  ;;  %v363_v27 = vpop.eup %362  ;;  %v173_v29 = vmul.f32 %v492_v21, %v489_v10  ;;  %vm165_vm10 = vmor %vm163_vm2, %vm164_vm6  ;;  %vm178_vm11 = vweird.f32 %v492_v21  ;;  %vm219_vm2 = vcmask 1040384  }
  0x4f   :  { %v160_v24 = vsub.f32 1.0, %v159_v19  ;;  %v187_v32 = vmul.f32 %v363_v27, %v143_v11  ;;  %vm192_vm13 = vweird.f32 %v363_v27  ;;  %vm530_vm15 = vmor %vm177_vm7, %vm178_vm11  ;;  %vm227_vm6 = vcmask 1043459  }
  0x50   :  { %v147_v28 = vmul.f32 %v357_v12, %v146_v20  ;;  %v174_v35 = vsub.f32 1.0, %v173_v29  ;;  %vm193_vm1 = vmor %vm191_vm9, %vm192_vm13  ;;  %v220_v3 = vsel %vm219_vm2, %v44_v33, %v216_v46  ;;  %v226_v5 = vsel %vm225_vm5, %v44_v33, %v216_v46 }
  0x51   :  { %v161_v31 = vmul.f32 %v359_v17, %v160_v24  ;;  %v188_v40 = vsub.f32 1.0, %v187_v32  ;;  %v228_v8 = vsel %vm227_vm6, %v217_v53, %v218_v58  ;;  %vm229_vm7 = vcmask 1042433  }
  0x52   :  { %v148_v34 = vadd.f32 %v357_v12, %v147_v28  ;;  %v175_v44 = vmul.f32 %v492_v21, %v174_v35  ;;  %v230_v13 = vsel %vm229_vm7, %v226_v5, %v228_v8  ;;  %v450_v32 = vmov 0.0  }
  0x53   :  { %v162_v39 = vadd.f32 %v359_v17, %v161_v31  ;;  %v189_v49 = vmul.f32 %v363_v27, %v188_v40  ;;  %v231_v20 = vrot.slane %v230_v13, 1 }
  0x54   :  { %v152_v47 = vsel %vm508_vm8, %v357_v12, %v148_v34  ;;  %v176_v51 = vadd.f32 %v492_v21, %v175_v44 }
  0x55   :  { %v166_v48 = vsel %vm165_vm10, %v359_v17, %v162_v39  ;;  %v190_v56 = vadd.f32 %v363_v27, %v189_v49  ;;  %v157_v59 = vsel %vm494_vm3, %v156_v23, %v152_v47  ;;  %vm223_vm3 = vcmask 1041408  }
  0x56   :  { %v171_v50 = vsel %vm498_vm4, %v170_v26, %v166_v48  ;;  %vm221_vm4 = vcmask 1042434   ;;  %v180_v61 = vsel %vm530_vm15, %v492_v21, %v176_v51  ;;  %v235_v28 = vperm.slane %v231_v20, 1 }
  0x57   :  { %v204_v54 = vrot.slane %v171_v50, 4  ;;  %v194_v62 = vsel %vm193_vm1, %v363_v27, %v190_v56  ;;  %v222_v4 = vsel %vm221_vm4, %v217_v53, %v218_v58  ;;  %v185_v7 = vsel %vm515_vm12, %v184_v0, %v180_v61 }
  0x58   :  { %v199_v1 = vsel %vm524_vm14, %v198_v57, %v194_v62  ;;  %v224_v12 = vsel %vm223_vm3, %v220_v3, %v222_v4  ;;  %v234_v27 = vperm.slane %v231_v20, 0  ;;  %vm324_vm12 = vcmask 1047559  }
  0x59   :  { %v206_v60 = vsel %vm58_vm0, %v157_v59, %v204_v54  ;;  %v205_v2 = vrot.slane %v199_v1, 4  ;;  %v232_v17 = vperm.slane %v224_v12, 0  ;;  %v233_v21 = vperm.slane %v224_v12, 1 }
  0x5a   :  { %v210_v63 = vmul.f32 %v479_v42, %v206_v60  ;;  %v214_v42 = vlaneseq }
  0x5b   :  { %v207_v9 = vsel %vm58_vm0, %v185_v7, %v205_v2 }
  0x5c   :  { %v212_v6 = vadd.f32 1e-06, %v210_v63  ;;  %v211_v11 = vmul.f32 %v482_v43, %v207_v9  ;;  %v215_v16 = vshrl.u32 %v214_v42, 7 }
  0x5e   :  { %v248_v10 = vsub.f32 1.0, %v212_v6  ;;  %364 = vlog2.f32 %v212_v6  ;;  %v213_v15 = vadd.f32 1e-06, %v211_v11  ;;  %vm236_vm8 = vcmp.eq.s32.totalorder %v215_v16, %v232_v17 }
  0x5f   :  { %vm237_vm9 = vcmp.eq.s32.totalorder %v215_v16, %v233_v21  ;;  %v240_v33 = vsel %vm236_vm8, 1.0, %v450_v32  ;;  %vm238_vm10 = vcmp.eq.s32.totalorder %v215_v16, %v234_v27  ;;  %vm239_vm11 = vcmp.eq.s32.totalorder %v215_v16, %v235_v28 }
  0x60   :  { %v250_v14 = vadd.f32 1e-06, %v248_v10  ;;  %v249_v19 = vsub.f32 1.0, %v213_v15  ;;  %366 = vlog2.f32 %v213_v15  ;;  %v241_v34 = vsel %vm237_vm9, 1.0, %v450_v32 }
  0x61   :  { %v244_v36 = vadd.f32 0.1, %v240_v33  ;;  %v245_v37 = vadd.f32 0.1, %v241_v34  ;;  %v242_v38 = vsel %vm238_vm10, 1.0, %v450_v32  ;;  %v243_v39 = vsel %vm239_vm11, 1.0, %v450_v32 }
  0x62   :  { %v252_v18 = vmul.f32 %v250_v14, %v250_v14  ;;  %v251_v24 = vadd.f32 1e-06, %v249_v19  ;;  %v246_v44 = vadd.f32 0.1, %v242_v38  ;;  %v247_v45 = vadd.f32 0.1, %v243_v39 }
  0x64   :  { %v365_v22 = vpop.eup %364  ;;  %v254_v23 = vmul.f32 -0.25, %v252_v18  ;;  %v253_v26 = vmul.f32 %v251_v24, %v251_v24 }
  0x65   :  { %v257_v25 = vmul.f32 0.6931472, %v365_v22 }
  0x66   :  { %v367_v29 = vpop.eup %366  ;;  %v255_v30 = vmul.f32 -0.25, %v253_v26 }
  0x67   :  { %v260_v43 = vmul.f32 %v257_v25, %v254_v23  ;;  %v259_v31 = vmul.f32 0.6931472, %v367_v29 }
  0x69   :  { %264 = vst [vmem:[#allocation1] ss:$2 sm:$0xff] %v260_v43  ;;  %v261_v35 = vmul.f32 %v259_v31, %v255_v30 }
  0x6b   :  { %268 = vst [vmem:[#allocation1 + $0x10] ss:$2 sm:$0xff] %v261_v35 }
  0x70   :  { %v265_v40 = vld.sshfl [vmem:[#allocation1] sm:$0xff pattern:$0x75316420]  ;;  %v266_v41 = vld.sshfl [vmem:[#allocation1 + $0x8] sm:$0xff pattern:$0x75316420] }
  0x71   :  { %v275_v46 = vmul.f32 %v265_v40, %v244_v36  ;;  %v276_v47 = vmul.f32 %v266_v41, %v245_v37 }
  0x72   :  { %v269_v50 = vld.sshfl [vmem:[#allocation1 + $0x10] sm:$0xff pattern:$0x75316420]  ;;  %v270_v51 = vld.sshfl [vmem:[#allocation1 + $0x18] sm:$0xff pattern:$0x75316420] }
  0x73   :  { %v279_v48 = vsel %vm58_vm0, %v275_v46, 0.0  ;;  %v286_v49 = vsel %vm58_vm0, %v276_v47, 0.0  ;;  %v277_v52 = vmul.f32 %v269_v50, %v246_v44  ;;  %v278_v53 = vmul.f32 %v270_v51, %v247_v45 }
  0x74   :  { %v280_v54 = vrot.slane %v279_v48, 4  ;;  %v287_v55 = vrot.slane %v286_v49, 4 }
  0x75   :  { %v293_v58 = vsel %vm58_vm0, %v277_v52, 0.0  ;;  %v300_v59 = vsel %vm58_vm0, %v278_v53, 0.0  ;;  %vm322_vm0 = vcmask 1045509  }
  0x76   :  { %v281_v56 = vadd.f32 %v280_v54, %v279_v48  ;;  %v288_v57 = vadd.f32 %v287_v55, %v286_v49  ;;  %v294_v60 = vrot.slane %v293_v58, 4  ;;  %v301_v61 = vrot.slane %v300_v59, 4 }
  0x78   :  { %v289_v62 = vrot.slane %v288_v57, 2  ;;  %v282_v63 = vrot.slane %v281_v56, 2  ;;  %v295_v0 = vadd.f32 %v294_v60, %v293_v58  ;;  %v302_v1 = vadd.f32 %v301_v61, %v300_v59 }
  0x7a   :  { %v290_v2 = vadd.f32 %v289_v62, %v288_v57  ;;  %v296_v3 = vrot.slane %v295_v0, 2  ;;  %v303_v4 = vrot.slane %v302_v1, 2  ;;  %v283_v6 = vadd.f32 %v282_v63, %v281_v56 }
  0x7c   :  { %v291_v5 = vrot.slane %v290_v2, 1  ;;  %v297_v7 = vadd.f32 %v296_v3, %v295_v0  ;;  %v304_v8 = vadd.f32 %v303_v4, %v302_v1  ;;  %v284_v11 = vrot.slane %v283_v6, 1 }
  0x7e   :  { %v292_v9 = vadd.f32 %v291_v5, %v290_v2  ;;  %v298_v42 = vrot.slane %v297_v7, 1  ;;  %v305_v10 = vrot.slane %v304_v8, 1  ;;  %v285_v16 = vadd.f32 %v284_v11, %v283_v6 }
  0x80   :  { %v306_v12 = vadd.f32 %v305_v10, %v304_v8  ;;  %v299_v13 = vadd.f32 %v298_v42, %v297_v7  ;;  %v311_v14 = vrot.slane %v292_v9, 6 }
  0x82   :  { %v312_v15 = vrot.slane %v306_v12, 6  ;;  %v313_v19 = vsel %vm223_vm3, %v285_v16, %v311_v14 }
  0x84   :  { %v314_v17 = vsel %vm223_vm3, %v299_v13, %v312_v15 }
  0x85   :  { %v319_v18 = vrot.slane %v314_v17, 7 }
  0x87   :  { %v320_v20 = vsel %vm225_vm5, %v319_v18, %v313_v19 }
  0x88   :  { %v321_v21 = vsel %vm227_vm6, %v319_v18, %v320_v20 }
  0x89   :  { %v323_v22 = vsel %vm322_vm0, %v319_v18, %v321_v21 }
  0x8a   :  { %v325_v23 = vsel %vm324_vm12, %v319_v18, %v323_v22 }
  0x8b   :  { %327 = vst [vmem:[#allocation7] sm:$0xf] %v325_v23 }
  0x8c   :  { %338 = dma.vmem_to_hbm [thread:$0]  %s334_s1, 64, %s336_s23, [#allocation4]  }
  0x8d   :  { %444 = dma.done.wait [#allocation4], 64  }
  0x8e   :  { %445 = vsyncadd [#allocation4], 4294967232 }
  0x8f   :  { %343 = vsyncpa [#allocation3], 1 }
  0x90   :  { %344 = vsyncpa [#allocation6], 1 }
  0x91   :  { %345 = vsyncpa [#allocation4], 1 }

</bundles_post_ra>
